<compile_context>
chip_gen: v7x
topology: tpu7x:2x2x1
jax: 0.10.0
libtpu: 0.0.40
codegen_flags: <defaults>
</compile_context>

<pallas_src>
import functools

import jax
import jax.numpy as jnp
from jax.experimental import pallas as pl
from jax.experimental.pallas import tpu as pltpu

LANES = 128
MAX_TILE_ROWS = 8192   # 4 MiB per f32 input block; 16 MiB double-buffered for 2 inputs
CHUNK_ROWS = 512       # in-kernel consumption granularity (bounds f32 temporaries)
NUM_SLICES = 2         # leading "parallel" grid axis (2 TCs on v7x; serial elsewhere)
NUM_STATS = 5          # sum(x), sum(t), sum(x*x), sum(t*t), sum(x*t)


def _round_up(v, m):
    return ((v + m - 1) // m) * m


def _sublane_align(dtype):
    # Native sublane tile height: f32 -> 8, bf16 -> 16, int8/fp8 -> 32.
    return {4: 8, 2: 16, 1: 32}.get(jnp.dtype(dtype).itemsize, 8)


def _corr_stats_kernel(x_ref, t_ref, out_ref, *,
                       tile_rows: int, chunk_rows: int, rows_total: int,
                       blocks_per_slice: int, needs_mask: bool):
    """Accumulate per-slice raw-moment statistics into out_ref of shape (1, 5, 8, 128)."""
    k = pl.program_id(1)

    @pl.when(k == 0)
    def _init():
        out_ref[...] = jnp.zeros_like(out_ref)

    n_chunks = tile_rows // chunk_rows

    def sweep(masked, valid_rows):
        @pl.loop(0, n_chunks)
        def _(c):
            r0 = pl.multiple_of(c * chunk_rows, chunk_rows)
            x = x_ref[pl.ds(r0, chunk_rows), :].astype(jnp.float32)
            t = t_ref[pl.ds(r0, chunk_rows), :].astype(jnp.float32)
            if masked:
                row_ids = jax.lax.broadcasted_iota(
                    jnp.int32, (chunk_rows, LANES), 0) + r0
                m = row_ids < valid_rows
                x = jnp.where(m, x, 0.0)
                t = jnp.where(m, t, 0.0)
            # (chunk,128) -> (chunk//8, 8, 128): pure relabeling of vreg tiles; the
            # axis-0 sums are elementwise vreg adds (VALU only).  The single
            # cross-lane/sublane reduction happens once, in the wrapper.
            x3 = x.reshape(chunk_rows // 8, 8, LANES)
            t3 = t.reshape(chunk_rows // 8, 8, LANES)
            out_ref[0, 0, :, :] += jnp.sum(x3, axis=0)
            out_ref[0, 1, :, :] += jnp.sum(t3, axis=0)
            out_ref[0, 2, :, :] += jnp.sum(x3 * x3, axis=0)
            out_ref[0, 3, :, :] += jnp.sum(t3 * t3, axis=0)
            out_ref[0, 4, :, :] += jnp.sum(x3 * t3, axis=0)
            # TODO(synk): on v7x the five row-sum chains could be offloaded to the idle
            # MXU (ones(1, chunk) @ [...]) to shave VALU pressure; neutral on v5e/v6e.

    if needs_mask:
        block = pl.program_id(0) * blocks_per_slice + k
        valid_rows = rows_total - block * tile_rows  # may be <= 0 (phantom block)

        @pl.when(valid_rows >= tile_rows)
        def _full():
            sweep(False, None)

        @pl.when(valid_rows < tile_rows)
        def _ragged():
            sweep(True, valid_rows)
    else:
        sweep(False, None)


def corr_layer_loss(x, t):
    """Pallas equivalent of _CorrLayer_loss.forward(X, T) -> scalar loss."""
    xf = jnp.ravel(x)
    tf = jnp.ravel(t)
    n_valid = int(xf.shape[0])

    # Lane-dense [rows, 128] view.  Pad with zeros only when N is not a multiple of 128
    # (zeros contribute nothing to any statistic; the wrapper divides by the true count).
    # In the common aligned case this is a free reshape, not an HBM copy.
    rows = pl.cdiv(n_valid, LANES)
    n128 = rows * LANES
    if n128 != n_valid:
        xf = jnp.pad(xf, (0, n128 - n_valid))
        tf = jnp.pad(tf, (0, n128 - n_valid))
    x2 = xf.reshape(rows, LANES)
    t2 = tf.reshape(rows, LANES)

    # Tile selection: split rows across NUM_SLICES (parallel axis), tiles up to
    # MAX_TILE_ROWS rows, consumed in CHUNK_ROWS chunks inside the kernel.
    align = max(_sublane_align(x2.dtype), _sublane_align(t2.dtype))
    target = pl.cdiv(rows, NUM_SLICES)
    if target > CHUNK_ROWS:
        tile_rows = min(MAX_TILE_ROWS, _round_up(target, CHUNK_ROWS))
        chunk_rows = CHUNK_ROWS
    else:
        tile_rows = _round_up(target, align)
        chunk_rows = tile_rows

    total_blocks = pl.cdiv(rows, tile_rows)
    n_slices = min(NUM_SLICES, total_blocks)
    blocks_per_slice = pl.cdiv(total_blocks, n_slices)
    # A ragged or phantom block exists iff the grid covers more rows than the array has.
    needs_mask = (n_slices * blocks_per_slice * tile_rows != rows)

    def in_map(s, k):
        # Clamp phantom blocks (last slice when total_blocks % n_slices != 0) onto the
        # last real block; the kernel masks their contribution to zero.
        return (jnp.minimum(s * blocks_per_slice + k, total_blocks - 1), 0)

    kernel = functools.partial(
        _corr_stats_kernel,
        tile_rows=tile_rows, chunk_rows=chunk_rows, rows_total=rows,
        blocks_per_slice=blocks_per_slice, needs_mask=needs_mask)

    stats = pl.pallas_call(
        kernel,
        out_shape=jax.ShapeDtypeStruct((n_slices, NUM_STATS, 8, LANES), jnp.float32),
        grid_spec=pltpu.PrefetchScalarGridSpec(
            num_scalar_prefetch=0,
            grid=(n_slices, blocks_per_slice),
            in_specs=[
                pl.BlockSpec((tile_rows, LANES), in_map),
                pl.BlockSpec((tile_rows, LANES), in_map),
            ],
            out_specs=pl.BlockSpec((1, NUM_STATS, 8, LANES),
                                   lambda s, k: (s, 0, 0, 0)),
        ),
        compiler_params=pltpu.CompilerParams(
            dimension_semantics=("parallel", "arbitrary"),
            vmem_limit_bytes=32 * 1024 * 1024),
    )(x2, t2)

    # Tiny final combine / normalize (a handful of scalars) in plain JAX.
    # TODO(synk): single-pass raw moments in f32 can lose precision when |mean| >> std;
    # a shifted/compensated accumulation would harden it (kept to match the module).
    sums = jnp.sum(stats, axis=(0, 2, 3))          # (5,)
    n = jnp.float32(n_valid)
    sx, st, sxx, stt, sxt = sums[0], sums[1], sums[2], sums[3], sums[4]
    cov = sxt - sx * st / n
    var_x = sxx - sx * sx / n
    var_t = stt - st * st / n
    corr = cov * jax.lax.rsqrt(var_x * var_t)      # rsqrt(0) -> inf, same as naive ref
    return 1.0 - corr


def _reference(x, t):
    xf = jnp.ravel(x).astype(jnp.float32)
    tf = jnp.ravel(t).astype(jnp.float32)
    xm = xf - jnp.mean(xf)
    tm = tf - jnp.mean(tf)
    corr = jnp.sum(xm * tm) / jnp.sqrt(jnp.sum(xm * xm) * jnp.sum(tm * tm))
    return 1.0 - corr


if __name__ == "__main__":
    key = jax.random.PRNGKey(0)
    kx, kt = jax.random.split(key)
    # Inputs consistent with the module (any NCHW tensors; they are flattened).
    X = jax.random.normal(kx, (2, 4, 16, 16), dtype=jnp.float32)
    T = 0.7 * X + 0.3 * jax.random.normal(kt, (2, 4, 16, 16), dtype=jnp.float32)

    loss = corr_layer_loss(X, T)
    jax.block_until_ready(loss)

    ref = _reference(X, T)
    assert jnp.allclose(loss, ref, atol=2e-5, rtol=2e-5), (loss, ref)
    print("KERNEL_OK")
</pallas_src>

<mosaic_0001>
module attributes {stable_mosaic.version = 11 : i64} {
  func.func @_corr_stats_kernel(%arg0: i32, %arg1: i32, %arg2: memref<8x128xf32, #tpu.memory_space<vmem>>, %arg3: memref<8x128xf32, #tpu.memory_space<vmem>>, %arg4: memref<1x5x8x128xf32, #tpu.memory_space<vmem>>) attributes {dimension_semantics = [#tpu.dimension_semantics<parallel>, #tpu.dimension_semantics<arbitrary>], iteration_bounds = array<i64: 2, 1>, scalar_prefetch = 0 : i64, scratch_operands = 0 : i64, tpu.core_type = #tpu.core_type<tc>, window_params = [{transform_indices = @transform_0, window_bounds = array<i64: 8, 128>}, {transform_indices = @transform_1, window_bounds = array<i64: 8, 128>}, {transform_indices = @transform_2, window_bounds = array<i64: 1, 5, 8, 128>}]} {
    %c0_i32 = arith.constant 0 : i32
    %0 = arith.cmpi eq, %arg1, %c0_i32 : i32
    %1 = arith.extui %0 : i1 to i32
    %c0_i32_0 = arith.constant 0 : i32
    %2 = arith.cmpi ne, %1, %c0_i32_0 : i32
    scf.if %2 {
      %cst_45 = arith.constant 0.000000e+00 : f32
      %51 = vector.broadcast %cst_45 : f32 to vector<1x5x8x128xf32>
      %c0_46 = arith.constant 0 : index
      %c0_47 = arith.constant 0 : index
      %c0_48 = arith.constant 0 : index
      %c0_49 = arith.constant 0 : index
      %52 = vector.load %arg4[%c0_46, %c0_47, %c0_48, %c0_49] : memref<1x5x8x128xf32, #tpu.memory_space<vmem>>, vector<1x5x8x128xf32>
      tpu.vector_store %arg4[%c0_46, %c0_47, %c0_48, %c0_49], %51 {strides = array<i32>} : memref<1x5x8x128xf32, #tpu.memory_space<vmem>>, vector<1x5x8x128xf32>,
    } else {
    }
    %c0_i32_1 = arith.constant 0 : i32
    %c1_i32 = arith.constant 1 : i32
    %3 = arith.muli %c0_i32_1, %c1_i32 : i32
    %c0_i32_2 = arith.constant 0 : i32
    %4 = arith.addi %c0_i32_2, %3 : i32
    %c8_i32 = arith.constant 8 : i32
    %5 = arith.muli %4, %c8_i32 : i32
    %6 = tpu.assume_multiple %5, 8 : i32
    %7 = arith.index_cast %6 : i32 to index
    %c0 = arith.constant 0 : index
    %8 = vector.load %arg2[%7, %c0] : memref<8x128xf32, #tpu.memory_space<vmem>>, vector<8x128xf32>
    %9 = arith.index_cast %6 : i32 to index
    %c0_3 = arith.constant 0 : index
    %10 = vector.load %arg3[%9, %c0_3] : memref<8x128xf32, #tpu.memory_space<vmem>>, vector<8x128xf32>
    %11 = vector.shape_cast %8 : vector<8x128xf32> to vector<1x8x128xf32>
    %12 = vector.shape_cast %10 : vector<8x128xf32> to vector<1x8x128xf32>
    %c0_4 = arith.constant 0 : index
    %c0_5 = arith.constant 0 : index
    %c0_6 = arith.constant 0 : index
    %c0_7 = arith.constant 0 : index
    %13 = vector.load %arg4[%c0_4, %c0_5, %c0_6, %c0_7] : memref<1x5x8x128xf32, #tpu.memory_space<vmem>>, vector<1x1x8x128xf32>
    %14 = vector.shape_cast %13 : vector<1x1x8x128xf32> to vector<8x128xf32>
    %cst = arith.constant dense<0.000000e+00> : vector<8x128xf32>
    %15 = vector.multi_reduction <add>, %11, %cst [0] : vector<1x8x128xf32> to vector<8x128xf32>
    %16 = arith.addf %14, %15 : vector<8x128xf32>
    %c0_8 = arith.constant 0 : index
    %c0_9 = arith.constant 0 : index
    %c0_10 = arith.constant 0 : index
    %c0_11 = arith.constant 0 : index
    %17 = vector.load %arg4[%c0_8, %c0_9, %c0_10, %c0_11] : memref<1x5x8x128xf32, #tpu.memory_space<vmem>>, vector<1x1x8x128xf32>
    %18 = vector.shape_cast %17 : vector<1x1x8x128xf32> to vector<8x128xf32>
    %19 = vector.shape_cast %16 : vector<8x128xf32> to vector<1x1x8x128xf32>
    tpu.vector_store %arg4[%c0_8, %c0_9, %c0_10, %c0_11], %19 {strides = array<i32>} : memref<1x5x8x128xf32, #tpu.memory_space<vmem>>, vector<1x1x8x128xf32>,
    %c0_12 = arith.constant 0 : index
    %c1 = arith.constant 1 : index
    %c0_13 = arith.constant 0 : index
    %c0_14 = arith.constant 0 : index
    %20 = vector.load %arg4[%c0_12, %c1, %c0_13, %c0_14] : memref<1x5x8x128xf32, #tpu.memory_space<vmem>>, vector<1x1x8x128xf32>
    %21 = vector.shape_cast %20 : vector<1x1x8x128xf32> to vector<8x128xf32>
    %cst_15 = arith.constant dense<0.000000e+00> : vector<8x128xf32>
    %22 = vector.multi_reduction <add>, %12, %cst_15 [0] : vector<1x8x128xf32> to vector<8x128xf32>
    %23 = arith.addf %21, %22 : vector<8x128xf32>
    %c0_16 = arith.constant 0 : index
    %c1_17 = arith.constant 1 : index
    %c0_18 = arith.constant 0 : index
    %c0_19 = arith.constant 0 : index
    %24 = vector.load %arg4[%c0_16, %c1_17, %c0_18, %c0_19] : memref<1x5x8x128xf32, #tpu.memory_space<vmem>>, vector<1x1x8x128xf32>
    %25 = vector.shape_cast %24 : vector<1x1x8x128xf32> to vector<8x128xf32>
    %26 = vector.shape_cast %23 : vector<8x128xf32> to vector<1x1x8x128xf32>
    tpu.vector_store %arg4[%c0_16, %c1_17, %c0_18, %c0_19], %26 {strides = array<i32>} : memref<1x5x8x128xf32, #tpu.memory_space<vmem>>, vector<1x1x8x128xf32>,
    %c0_20 = arith.constant 0 : index
    %c2 = arith.constant 2 : index
    %c0_21 = arith.constant 0 : index
    %c0_22 = arith.constant 0 : index
    %27 = vector.load %arg4[%c0_20, %c2, %c0_21, %c0_22] : memref<1x5x8x128xf32, #tpu.memory_space<vmem>>, vector<1x1x8x128xf32>
    %28 = vector.shape_cast %27 : vector<1x1x8x128xf32> to vector<8x128xf32>
    %29 = arith.mulf %11, %11 : vector<1x8x128xf32>
    %cst_23 = arith.constant dense<0.000000e+00> : vector<8x128xf32>
    %30 = vector.multi_reduction <add>, %29, %cst_23 [0] : vector<1x8x128xf32> to vector<8x128xf32>
    %31 = arith.addf %28, %30 : vector<8x128xf32>
    %c0_24 = arith.constant 0 : index
    %c2_25 = arith.constant 2 : index
    %c0_26 = arith.constant 0 : index
    %c0_27 = arith.constant 0 : index
    %32 = vector.load %arg4[%c0_24, %c2_25, %c0_26, %c0_27] : memref<1x5x8x128xf32, #tpu.memory_space<vmem>>, vector<1x1x8x128xf32>
    %33 = vector.shape_cast %32 : vector<1x1x8x128xf32> to vector<8x128xf32>
    %34 = vector.shape_cast %31 : vector<8x128xf32> to vector<1x1x8x128xf32>
    tpu.vector_store %arg4[%c0_24, %c2_25, %c0_26, %c0_27], %34 {strides = array<i32>} : memref<1x5x8x128xf32, #tpu.memory_space<vmem>>, vector<1x1x8x128xf32>,
    %c0_28 = arith.constant 0 : index
    %c3 = arith.constant 3 : index
    %c0_29 = arith.constant 0 : index
    %c0_30 = arith.constant 0 : index
    %35 = vector.load %arg4[%c0_28, %c3, %c0_29, %c0_30] : memref<1x5x8x128xf32, #tpu.memory_space<vmem>>, vector<1x1x8x128xf32>
    %36 = vector.shape_cast %35 : vector<1x1x8x128xf32> to vector<8x128xf32>
    %37 = arith.mulf %12, %12 : vector<1x8x128xf32>
    %cst_31 = arith.constant dense<0.000000e+00> : vector<8x128xf32>
    %38 = vector.multi_reduction <add>, %37, %cst_31 [0] : vector<1x8x128xf32> to vector<8x128xf32>
    %39 = arith.addf %36, %38 : vector<8x128xf32>
    %c0_32 = arith.constant 0 : index
    %c3_33 = arith.constant 3 : index
    %c0_34 = arith.constant 0 : index
    %c0_35 = arith.constant 0 : index
    %40 = vector.load %arg4[%c0_32, %c3_33, %c0_34, %c0_35] : memref<1x5x8x128xf32, #tpu.memory_space<vmem>>, vector<1x1x8x128xf32>
    %41 = vector.shape_cast %40 : vector<1x1x8x128xf32> to vector<8x128xf32>
    %42 = vector.shape_cast %39 : vector<8x128xf32> to vector<1x1x8x128xf32>
    tpu.vector_store %arg4[%c0_32, %c3_33, %c0_34, %c0_35], %42 {strides = array<i32>} : memref<1x5x8x128xf32, #tpu.memory_space<vmem>>, vector<1x1x8x128xf32>,
    %c0_36 = arith.constant 0 : index
    %c4 = arith.constant 4 : index
    %c0_37 = arith.constant 0 : index
    %c0_38 = arith.constant 0 : index
    %43 = vector.load %arg4[%c0_36, %c4, %c0_37, %c0_38] : memref<1x5x8x128xf32, #tpu.memory_space<vmem>>, vector<1x1x8x128xf32>
    %44 = vector.shape_cast %43 : vector<1x1x8x128xf32> to vector<8x128xf32>
    %45 = arith.mulf %11, %12 : vector<1x8x128xf32>
    %cst_39 = arith.constant dense<0.000000e+00> : vector<8x128xf32>
    %46 = vector.multi_reduction <add>, %45, %cst_39 [0] : vector<1x8x128xf32> to vector<8x128xf32>
    %47 = arith.addf %44, %46 : vector<8x128xf32>
    %c0_40 = arith.constant 0 : index
    %c4_41 = arith.constant 4 : index
    %c0_42 = arith.constant 0 : index
    %c0_43 = arith.constant 0 : index
    %48 = vector.load %arg4[%c0_40, %c4_41, %c0_42, %c0_43] : memref<1x5x8x128xf32, #tpu.memory_space<vmem>>, vector<1x1x8x128xf32>
    %49 = vector.shape_cast %48 : vector<1x1x8x128xf32> to vector<8x128xf32>
    %50 = vector.shape_cast %47 : vector<8x128xf32> to vector<1x1x8x128xf32>
    tpu.vector_store %arg4[%c0_40, %c4_41, %c0_42, %c0_43], %50 {strides = array<i32>} : memref<1x5x8x128xf32, #tpu.memory_space<vmem>>, vector<1x1x8x128xf32>,
    %c1_i32_44 = arith.constant 1 : i32
    return
  }
  func.func @transform_0(%arg0: i32, %arg1: i32) -> (i32, i32) {
    %c1_i32 = arith.constant 1 : i32
    %0 = arith.muli %arg0, %c1_i32 : i32
    %1 = arith.addi %0, %arg1 : i32
    %c1_i32_0 = arith.constant 1 : i32
    %2 = arith.minsi %1, %c1_i32_0 : i32
    %c0_i32 = arith.constant 0 : i32
    %c0_i32_1 = arith.constant 0 : i32
    return %2, %c0_i32 : i32, i32
  }
  func.func @transform_1(%arg0: i32, %arg1: i32) -> (i32, i32) {
    %c1_i32 = arith.constant 1 : i32
    %0 = arith.muli %arg0, %c1_i32 : i32
    %1 = arith.addi %0, %arg1 : i32
    %c1_i32_0 = arith.constant 1 : i32
    %2 = arith.minsi %1, %c1_i32_0 : i32
    %c0_i32 = arith.constant 0 : i32
    %c0_i32_1 = arith.constant 0 : i32
    return %2, %c0_i32 : i32, i32
  }
  func.func @transform_2(%arg0: i32, %arg1: i32) -> (i32, i32, i32, i32) {
    %c0_i32 = arith.constant 0 : i32
    %c0_i32_0 = arith.constant 0 : i32
    %c0_i32_1 = arith.constant 0 : i32
    %c0_i32_2 = arith.constant 0 : i32
    return %arg0, %c0_i32, %c0_i32_0, %c0_i32_1 : i32, i32, i32, i32
  }
}

</mosaic_0001>

<bundles_post_ra>
// kernel: tpu_custom_call.1
= control target key start
LH: loop header
LB: loop body
LE: loop exit
PB: predicated region body
PF: predicated region fallthrough
CT: control target
= control target key end

     0   :  { %7 = vsyncpa [#allocation3], 0  ;;  %s952_s0 = inlined_call_operand.hbm [shape: f32[16,128], index: 0, kind: input, shape index: {}]   ;;  %s953_s1 = inlined_call_operand.hbm [shape: f32[16,128], index: 1, kind: input, shape index: {}]   ;;  %s954_s2 = inlined_call_operand.hbm [shape: f32[2,5,8,128], index: 2, kind: output, shape index: {}]  }
   0x1   :  { %9 = vsyncpa [#allocation3 + $0x1], 0 }
   0x2   :  { %10 = vsyncpa [#allocation6], 0 }
   0x3   :  { %12 = vsyncpa [#allocation6 + $0x1], 0 }
   0x4   :  { %13 = vsyncpa [#allocation4], 0 }
   0x5   :  { %15 = vsyncpa [#allocation4 + $0x1], 0  ;;  %s698_s9 = smov 0   ;;  %s700_s10 = smov 0  }
   0x6   :  { %s702_s11 = smov 0   ;;  %s704_s12 = smov 0  }
   0x7   :  { %s706_s13 = smov 0   ;;  %s708_s14 = smov 0  }
   0x8   :  { %s710_s15 = smov 0   ;;  %s712_s16 = smov 0  }
   0x9   :  { %s714_s17 = smov 0  }
   0xa LB: > { %s388_s18 = sadd.s32 4294967295, %s676_s17   ;;  %s389_s19 = sadd.s32 4294967294, %s676_s17   ;;  %s676_s17 = sphi %s714_s17, %s21_s17   ;;  %s672_s16 = sphi %s712_s16, %s979_s16   ;;  %s668_s15 = sphi %s710_s15, %s978_s15   ;;  %s664_s14 = sphi %s708_s14, %s977_s14   ;;  %s660_s13 = sphi %s706_s13, %s976_s13   ;;  %s656_s12 = sphi %s704_s12, %s975_s12   ;;  %s652_s11 = sphi %s702_s11, %s974_s11   ;;  %s648_s10 = sphi %s700_s10, %s973_s10   ;;  %s644_s9 = sphi %s698_s9, %s972_s9  }
   0xb   : > { %s33_s20 = sadd.s32 1, %s672_s16  ;;  %p38_p0 = scmp.lt.s32.totalorder %s672_s16, 1 }
   0xc   : > { %p35_p1 = scmp.ge.s32.totalorder %s33_s20, 2  ;;  %s46_s21 = sadd.s32 1, %s664_s14 }
   0xd   : > { %s747_s22 = scalar_select %p38_p0, %s672_s16, 1 }
   0xe   : > { %s981_s20 = smov (%p35_p1, %s33_s20), 0  ;;  %p53_p2 = scmp.ne.s32.totalorder %s664_s14, %s660_s13 }
   0xf   : > { %p54_p3 = scmp.eq.s32.totalorder %s676_s17, 0  ;;  %p41_p4 = scmp.lt.s32.totalorder %s981_s20, 1 }
  0x10   : > { %p59_p5 = scmp.ne.s32.totalorder %s660_s13, %s656_s12  ;;  %p60_p7 = scmp.eq.s32.totalorder %s388_s18, 0 }
  0x11   : > { %p756_p6 = por %p54_p3, %p53_p2  ;;  %s101_s26 = ssub.s32 %s672_s16, %s981_s20 }
  0x12   : > { %s42_s24 = scalar_select %p41_p4, %s981_s20, 1 }
  0x13   : > { %p761_p8 = por %p60_p7, %p59_p5  ;;  %p102_p9 = scmp.eq.s32.totalorder %s101_s26, 0 }
  0x14   : > { %s43_s27 = ssub.s32 %s747_s22, %s42_s24  ;;  %s104_s28 = sadd.s32 1, %s652_s11 }
  0x15   : > { %s959_s25 = scalar_select %p761_p8, 1, 0 }
  0x16   : > { %p44_p10 = scmp.eq.s32.totalorder %s43_s27, 0  ;;  %p114_p11 = scmp.ne.s32.totalorder %s652_s11, %s648_s10 }
  0x17   : > { %s770_s29 = scalar_select %p102_p9, %s652_s11, %s104_s28  }
  0x18   : > { %s773_s30 = scalar_select %p44_p10, %s664_s14, %s46_s21  }
  0x19   : > { %p115_p12 = scmp.eq.s32.totalorder %s388_s18, 1  ;;  %p120_p13 = scmp.ne.s32.totalorder %s648_s10, %s644_s9 }
  0x1a   : > { %p121_p0 = scmp.eq.s32.totalorder %s389_s19, 1  ;;  %p429_p4 = scmp.lt.s32.totalorder %s676_s17, 2 }
  0x1b   : > { %p779_p1 = por %p115_p12, %p114_p11  ;;  %s790_s5 = sand.u32 1, %s664_s14  }
  0x1c   : > { %p784_p3 = por %p121_p0, %p120_p13  ;;  %s393_s6 = sshll.u32 %s747_s22, 7 }
  0x1d   : > { %s960_s3 = scalar_select %p779_p1, 1, 0 }
  0x1e   : > { %s961_s4 = scalar_select %p784_p3, 1, 0 }
  0x1f   : > { %s955_s7 = sshll.u32 %s790_s5, 3  ;;  %s799_s18 = scalar_lea.hbm %s952_s0, %s393_s6 }
  0x20   : > { %s145_s19 = scalar_lea.vmem [#allocation2], %s955_s7  ;;  %p805_p5 = pnand %p429_p4, %p756_p6 }
  0x21   : > { %s155_s21 = sshll.u32 %s145_s19, 4  ;;  %s142_s26 = scalar_lea.sflag [#allocation3], %s790_s5  ;;  %s809_s21 = int_to_ptr.vmem [resolvable:$true] %s155_s21 }
  0x22   : > { %s506_s27 = scalar_lea.hbm %s799_s18, 128  ;;  %p508_p11 = pneg %p805_p5 }
  0x23   : > { %p507_p10 = scmp.ne.s32.totalorder %s799_s18, %s506_s27  ;;  %s511_s8 = scalar_lea.hbm %s952_s0, 256 }
  0x24   : > { %p512_p6 = scmp.lt.u32.totalorder %s799_s18, %s952_s0  ;;  %p513_p0 = scmp.lt.u32.totalorder %s511_s8, %s506_s27 }
  0x25   : > { %p509_p12 = pnand %p508_p11, %p507_p10  ;;  %p515_p2 = scmp.lt.u32.totalorder %s506_s27, %s799_s18 }
  0x26   : > { %p514_p4 = por %p513_p0, %p512_p6 }
  0x27   : > { %p510_p13 = pneg %p509_p12 }
  0x28   : > { %p516_p7 = por %p515_p2, %p514_p4 }
  0x2a   : > { %p517_p9 = pnand %p516_p7, %p510_p13 }
  0x2c   : > { %520 = shalt.err (!%p517_p9)
}
  0x2d   : > { %s521_s7 = scalar_lea.vmem %s809_s21, 128  ;;  %s678_s23 = smov [#allocation2]  }
  0x2e   : > { %p522_p10 = scmp.ne.s32.totalorder %s809_s21, %s521_s7  ;;  %s526_s28 = sshll.u32 %s678_s23, 4  ;;  %s527_s28 = int_to_ptr.vmem [resolvable:$false] %s526_s28 }
  0x2f   : > { %s528_s12 = scalar_lea.vmem %s527_s28, 256  ;;  %p529_p1 = scmp.lt.s32.totalorder %s809_s21, %s527_s28 }
  0x30   : > { %p524_p12 = pnand %p522_p10, %p508_p11  ;;  %p530_p6 = scmp.lt.s32.totalorder %s528_s12, %s521_s7 }
  0x32   : > { %p525_p3 = pneg %p524_p12  ;;  %p531_p0 = por %p530_p6, %p529_p1 }
  0x34   : > { %p532_p2 = pnand %p531_p0, %p525_p3 }
  0x36   : > { %535 = shalt.err (!%p532_p2)
}
  0x37   : > { %421 = dma.hbm_to_vmem [thread:$0]  (!%p805_p5), %s799_s18, 128, %s809_s21, %s142_s26  }
  0x38   : > { %p963_p7 = scmp.lt.s32.totalorder %s676_s17, 3  ;;  %p964_p9 = scmp.ge.s32.totalorder %s676_s17, 1 }
  0x39   : > { %s852_s19 = scalar_lea.hbm %s953_s1, %s393_s6  ;;  %s966_s23 = sshll.u32 %s790_s5, 3 }
  0x3a   : > { %p843_p13 = pnand %p964_p9, %p963_p7  ;;  %s166_s28 = scalar_lea.vmem [#allocation5], %s966_s23 }
  0x3b   : > { %s176_s12 = sshll.u32 %s166_s28, 4  ;;  %s163_s18 = scalar_lea.sflag [#allocation6], %s790_s5  ;;  %s177_s12 = int_to_ptr.vmem [resolvable:$true] %s176_s12 }
  0x3c   : > { %s965_s27 = scalar_select %p843_p13, 1, 0 }
  0x3d   : > { %s536_s21 = scalar_lea.hbm %s852_s19, 128  ;;  %s541_s6 = scalar_lea.hbm %s953_s1, 256 }
  0x3e   : > { %p537_p1 = scmp.ne.s32.totalorder %s852_s19, %s536_s21  ;;  %p542_p10 = scmp.lt.u32.totalorder %s852_s19, %s953_s1 }
  0x3f   : > { %p543_p12 = scmp.lt.u32.totalorder %s541_s6, %s536_s21  ;;  %p545_p0 = scmp.lt.u32.totalorder %s536_s21, %s852_s19 }
  0x40   : > { %p539_p3 = pnand %p537_p1, %p508_p11 }
  0x41   : > { %p544_p6 = por %p543_p12, %p542_p10 }
  0x42   : > { %p540_p4 = pneg %p539_p3 }
  0x43   : > { %p546_p2 = por %p545_p0, %p544_p6 }
  0x45   : > { %p547_p7 = pnand %p546_p2, %p540_p4 }
  0x47   : > { %550 = shalt.err (!%p547_p7)
}
  0x48   : > { %s551_s5 = scalar_lea.vmem %s177_s12, 128  ;;  %s679_s23 = smov [#allocation5]  }
  0x49   : > { %p552_p9 = scmp.ne.s32.totalorder %s177_s12, %s551_s5  ;;  %s556_s28 = sshll.u32 %s679_s23, 4  ;;  %s557_s28 = int_to_ptr.vmem [resolvable:$false] %s556_s28 }
  0x4a   : > { %s558_s22 = scalar_lea.vmem %s557_s28, 256  ;;  %p559_p8 = scmp.lt.s32.totalorder %s177_s12, %s557_s28 }
  0x4b   : > { %p554_p1 = pnand %p552_p9, %p508_p11  ;;  %p560_p13 = scmp.lt.s32.totalorder %s558_s22, %s551_s5 }
  0x4d   : > { %p555_p3 = pneg %p554_p1  ;;  %p561_p10 = por %p560_p13, %p559_p8 }
  0x4f   : > { %p562_p12 = pnand %p561_p10, %p555_p3 }
  0x51   : > { %565 = shalt.err (!%p562_p12)
}
  0x52   : > { %424 = dma.hbm_to_vmem [thread:$0]  (!%p805_p5), %s852_s19, 128, %s177_s12, %s163_s18  }
  0x53   : > { %p967_p4 = scmp.ne.s32.totalorder %s965_s27, 0 }
  0x54   : > { %s187_s21 = sand.u32 (!%p967_p4), 1, %s660_s13   ;;  %p968_p11 = scmp.ne.s32.totalorder (!%p967_p4), %s959_s25, 0 }
  0x55   : > { %185 = sbr.rel (%p967_p4) target bundleno = 123 (0x7b), region = 28  ;;  %s397_s26 = sshll.u32 (!%p967_p4), %s187_s21, 3 }
  0x56   : > { %s188_s6 = scalar_lea.sflag (!%p967_p4), [#allocation3], %s187_s21  ;;  %s191_s7 = scalar_lea.vmem (!%p967_p4), [#allocation2], %s397_s26 }
  0x5c   : > { %631 = dma.done.wait (%p968_p11), %s188_s6, 128  }
  0x5d   : > { %633 = vsyncadd (%p968_p11), %s188_s6, 4294967168  ;;  %s197_s8 = scalar_lea.sflag [#allocation6], %s187_s21  ;;  %s200_s5 = scalar_lea.vmem [#allocation5], %s397_s26 }
  0x5e   : > { %635 = dma.done.wait (%p968_p11), %s197_s8, 128  }
  0x5f   : > { %637 = vsyncadd (%p968_p11), %s197_s8, 4294967168  ;;  %s223_s24 = sand.u32 1, %s648_s10   ;;  %s411_s19 = smul.u32 640, %s668_s15  ;;  %v241_v0 = vld [vmem:[%s191_s7] sm:$0xff]  ;;  %v242_v1 = vld [vmem:[%s200_s5] sm:$0xff] }
  0x60   : > { %s410_s27 = smul.u32 40, %s223_s24  ;;  %v254_v2 = vmul.f32 %v241_v0, %v241_v0  ;;  %v260_v3 = vmul.f32 %v242_v1, %v242_v1  ;;  %v266_v4 = vmul.f32 %v242_v1, %v241_v0  ;;  %s896_s15 = scalar_lea.sflag [#allocation4], %s223_s24 }
  0x61   : > { %s892_s25 = scalar_lea.hbm %s954_s2, %s411_s19  ;;  %p969_p5 = scmp.ne.s32.totalorder %s960_s3, 0 }
  0x62   : > { %s225_s12 = scalar_lea.vmem [#allocation7], %s410_s27  ;;  %s680_s21 = smov [#allocation7]  }
  0x63   : > { %s284_s18 = sshll.u32 %s225_s12, 4  ;;  %246 = vst [vmem:[%s225_s12] sm:$0xff] %v241_v0  ;;  %400 = vst [vmem:[%s225_s12 + $0x8] sm:$0xff] %v242_v1  ;;  %s570_s26 = sshll.u32 %s680_s21, 4  ;;  %s894_s18 = int_to_ptr.vmem [resolvable:$true] %s284_s18  ;;  %s571_s26 = int_to_ptr.vmem [resolvable:$false] %s570_s26 }
  0x64   : > { %402 = vst [vmem:[%s225_s12 + $0x10] sm:$0xff] %v254_v2  ;;  %404 = vst [vmem:[%s225_s12 + $0x18] sm:$0xff] %v260_v3  ;;  %s566_s22 = scalar_lea.vmem %s894_s18, 640  ;;  %s572_s6 = scalar_lea.vmem %s571_s26, 1280 }
  0x65   : > { %406 = vst [vmem:[%s225_s12 + $0x20] sm:$0xff] %v266_v4  ;;  %p567_p8 = scmp.ne.s32.totalorder %s894_s18, %s566_s22  ;;  %p573_p0 = scmp.lt.s32.totalorder %s894_s18, %s571_s26 }
  0x66   : > { %p574_p2 = scmp.lt.s32.totalorder %s572_s6, %s566_s22 }
  0x67   : > { %p568_p13 = pnand %p567_p8, %p969_p5 }
  0x68   : > { %p575_p7 = por %p574_p2, %p573_p0 }
  0x69   : > { %p569_p6 = pneg %p568_p13 }
  0x6b   : > { %p576_p9 = pnand %p575_p7, %p569_p6 }
  0x6d   : > { %579 = shalt.err (!%p576_p9)
}
  0x6e   : > { %s580_s7 = scalar_lea.hbm %s892_s25, 640  ;;  %s584_s24 = scalar_lea.hbm %s954_s2, 1280 }
  0x6f   : > { %p581_p1 = scmp.ne.s32.totalorder %s892_s25, %s580_s7  ;;  %p585_p12 = scmp.lt.u32.totalorder %s892_s25, %s954_s2 }
  0x70   : > { %p586_p4 = scmp.lt.u32.totalorder %s584_s24, %s580_s7  ;;  %p588_p8 = scmp.lt.u32.totalorder %s580_s7, %s892_s25 }
  0x71   : > { %p582_p3 = pnand %p581_p1, %p969_p5 }
  0x72   : > { %p587_p11 = por %p586_p4, %p585_p12 }
  0x73   : > { %p583_p10 = pneg %p582_p3 }
  0x74   : > { %p589_p13 = por %p588_p8, %p587_p11 }
  0x76   : > { %p590_p6 = pnand %p589_p13, %p583_p10 }
  0x78   : > { %593 = shalt.err (!%p590_p6)
}
  0x79   : > { %s681_s12 = smov 128   ;;  %s682_s23 = smov 8  }
  0x7a   : > { %416 = dma.vmem_to_hbm [thread:$0]  (%p969_p5), %s894_s18, 640, %s892_s25, %s896_s15, %s681_s12, %s681_s12, %s682_s23  }
  0x7b PF: > { %s299_s28 = sand.u32 1, %s644_s9   ;;  %p970_p0 = scmp.ne.s32.totalorder %s961_s4, 0 }
  0x7c   : > { %p971_p2 = scmp.ge.s32.totalorder %s676_s17, 2  ;;  %s300_s22 = scalar_lea.sflag [#allocation4], %s299_s28 }
  0x7e   : > { %p426_p7 = pnand %p971_p2, %p970_p0 }
  0x80   : > { %639 = dma.done.wait (!%p426_p7), %s300_s22, 640  }
  0x81   : > { %641 = vsyncadd (!%p426_p7), %s300_s22, 4294966656  ;;  %s21_s17 = sadd.s32 1, %s676_s17   ;;  %s972_s9 = smov %s648_s10 }
  0x82   : > { %p18_p9 = scmp.ge.s32.totalorder %s21_s17, 4   ;;  %s973_s10 = smov %s652_s11 }
  0x83   : > { %s974_s11 = smov %s770_s29  ;;  %s975_s12 = smov %s660_s13 }
  0x84   : > { %s976_s13 = smov %s664_s14  ;;  %s977_s14 = smov %s773_s30 }
  0x85   : > { %s978_s15 = smov %s672_s16  ;;  %s979_s16 = smov %s981_s20 }
  0x86   :  { %20 = sbr.rel (!%p18_p9) target bundleno = 10 (0xa), region = 94 }
  0x8d   :  { %305 = vsyncpa [#allocation3], 1 }
  0x8e   :  { %307 = vsyncpa [#allocation3 + $0x1], 1 }
  0x8f   :  { %308 = vsyncpa [#allocation6], 1 }
  0x90   :  { %310 = vsyncpa [#allocation6 + $0x1], 1 }
  0x91   :  { %311 = vsyncpa [#allocation4], 1 }
  0x92   :  { %313 = vsyncpa [#allocation4 + $0x1], 1 }

</bundles_post_ra>
